<compile_context>
chip_gen: v6e
topology: v6e:2x2x1
jax: 0.10.0
libtpu: 0.0.40
codegen_flags: <defaults>
</compile_context>

<pallas_src>
import jax
import jax.numpy as jnp
from jax.experimental import pallas as pl
from jax.experimental.pallas import tpu as pltpu


def _round_up(x: int, m: int) -> int:
    return (x + m - 1) // m * m


def _choose_tile_b(B: int) -> int:
    """Batch tile: full-dim for tiny B, else >=2 grid steps (v7x megacore), <=256."""
    if B <= 8:
        return B                      # block == full array dim (always legal)
    return min(256, _round_up((B + 1) // 2, 8))


def _vmem_cap_bytes() -> int:
    try:
        return int(pltpu.get_tpu_info().vmem_capacity_bytes)
    except Exception:
        return 64 << 20               # conservative fallback (v7x per-TC VMEM)


# ---------------------------------------------------------------------------
# Pallas kernel: single folded matmul + f32 bias
# ---------------------------------------------------------------------------
def _iddr_fused_kernel(cls_ref, w_ref, b_ref, o_ref):
    # [TILE_B, H_pad](bf16) @ [H_pad, N_pad](bf16) -> f32 MXU accumulation.
    acc = jnp.dot(cls_ref[...], w_ref[...], preferred_element_type=jnp.float32)
    # Bias kept in f32 (no bf16 round-trip), broadcast over rows.
    o_ref[...] = acc + b_ref[...]


# ---------------------------------------------------------------------------
# Wrapper: BlockSpecs, grid, VMEM budget, cost estimate
# ---------------------------------------------------------------------------
def iddr_classifier_heads(cls_bf, fused):
    """Folded hidden-projection + 3 classifier heads in one pallas_call.

    cls_bf : [B, H] bfloat16 ([CLS] token hidden state)
    fused  : dict with folded/padded weights (see fuse_and_pad_params)
    """
    B, H = cls_bf.shape
    H_pad, N_pad = fused["w"].shape
    n1, n2, n3 = fused["n1"], fused["n2"], fused["n3"]

    # Only pad the hidden dim when it is not already lane-aligned.
    if H_pad != H:
        cls_in = jnp.zeros((B, H_pad), jnp.bfloat16).at[:, :H].set(cls_bf)
    else:
        cls_in = cls_bf

    TILE_B = _choose_tile_b(B)
    grid = (pl.cdiv(B, TILE_B),)

    # Advisory cost estimate for the XLA scheduler.
    flops = 2 * B * H_pad * N_pad
    bytes_accessed = (B * H_pad * 2          # cls (bf16 in)
                      + H_pad * N_pad * 2    # folded weight (bf16)
                      + N_pad * 4            # folded bias (f32)
                      + B * N_pad * 4)       # out (f32)

    # VMEM budget: double-buffered activation/output tiles + resident weights
    # + headroom, capped below the physical per-TensorCore capacity.
    vmem_need = (2 * TILE_B * H_pad * 2
                 + 2 * TILE_B * N_pad * 4
                 + 2 * H_pad * N_pad * 2
                 + 2 * 8 * N_pad * 4
                 + (2 << 20))
    cap = _vmem_cap_bytes()
    vmem_limit = int(min(max(vmem_need, 16 << 20), cap - (8 << 20)))

    out = pl.pallas_call(
        _iddr_fused_kernel,
        out_shape=jax.ShapeDtypeStruct((B, N_pad), jnp.float32),
        grid=grid,
        in_specs=[
            pl.BlockSpec((TILE_B, H_pad), lambda i: (i, 0)),   # cls tile
            pl.BlockSpec((H_pad, N_pad), lambda i: (0, 0)),    # folded W (resident)
            pl.BlockSpec((1, N_pad), lambda i: (0, 0)),        # folded b (resident, f32)
        ],
        out_specs=pl.BlockSpec((TILE_B, N_pad), lambda i: (i, 0)),
        compiler_params=pltpu.CompilerParams(
            dimension_semantics=("parallel",),
            vmem_limit_bytes=vmem_limit),
        cost_estimate=pl.CostEstimate(
            flops=int(flops), transcendentals=0,
            bytes_accessed=int(bytes_accessed)),
    )(cls_in, fused["w"], fused["b"])

    return (out[:, :n1],
            out[:, n1:n1 + n2],
            out[:, n1 + n2:n1 + n2 + n3])


# ---------------------------------------------------------------------------
# Offline parameter fold + pad (weights stored [in, out] == PyTorch weight.T)
# ---------------------------------------------------------------------------
def fuse_and_pad_params(params):
    H = params["wh"].shape[0]
    n1 = params["w1"].shape[1]
    n2 = params["w2"].shape[1]
    n3 = params["w3"].shape[1]
    N = n1 + n2 + n3

    wc_raw = jnp.concatenate([params["w1"], params["w2"], params["w3"]], axis=1)  # [H, N]
    bc_raw = jnp.concatenate([params["b1"], params["b2"], params["b3"]], axis=1)  # [1, N]

    # Inference-only fold (Dropout == identity, no nonlinearity in between).
    w_fold = jnp.dot(params["wh"], wc_raw, preferred_element_type=jnp.float32)    # [H, N]
    b_fold = jnp.dot(params["bh"], wc_raw, preferred_element_type=jnp.float32) + bc_raw

    H_pad = _round_up(max(H, 128), 128)
    N_pad = _round_up(max(N, 128), 128)

    w = jnp.zeros((H_pad, N_pad), jnp.float32).at[:H, :N].set(w_fold)
    b = jnp.zeros((1, N_pad), jnp.float32).at[:, :N].set(b_fold)

    return {
        "w": w.astype(jnp.bfloat16),   # bf16 MXU operand
        "b": b,                        # keep bias in f32 (tiny; exact add)
        "n1": n1, "n2": n2, "n3": n3,
    }


# ---------------------------------------------------------------------------
# Synthetic encoder (stand-in for AutoModel) — only the [CLS] token is needed.
# ---------------------------------------------------------------------------
def encode_cls(input_ids, attention_mask, embed_table):
    """cls = embed(input_ids[:, 0]) * mask[:, 0], cast bf16 (fuses into the gather)."""
    cls_tok = jnp.take(embed_table, input_ids[:, 0], axis=0)                 # [B, H]
    cls = cls_tok * attention_mask[:, 0, None].astype(embed_table.dtype)
    return cls.astype(jnp.bfloat16)


def multi_iddr_classifier_forward(input_ids, attention_mask, params, fused):
    cls_bf = encode_cls(input_ids, attention_mask, params["embed"])
    l1, l2, l3 = iddr_classifier_heads(cls_bf, fused)
    return {
        "classifier_level_1": l1,
        "classifier_level_2": l2,
        "classifier_level_3": l3,
    }


def init_params(key, vocab, hidden, n1, n2, n3):
    ks = jax.random.split(key, 9)
    scale = 0.02
    return {
        "embed": scale * jax.random.normal(ks[0], (vocab, hidden), jnp.float32),
        # weights stored [in, out] (PyTorch Linear weight transposed)
        "wh": scale * jax.random.normal(ks[1], (hidden, hidden), jnp.float32),
        "bh": scale * jax.random.normal(ks[2], (1, hidden), jnp.float32),
        "w1": scale * jax.random.normal(ks[3], (hidden, n1), jnp.float32),
        "b1": scale * jax.random.normal(ks[4], (1, n1), jnp.float32),
        "w2": scale * jax.random.normal(ks[5], (hidden, n2), jnp.float32),
        "b2": scale * jax.random.normal(ks[6], (1, n2), jnp.float32),
        "w3": scale * jax.random.normal(ks[7], (hidden, n3), jnp.float32),
        "b3": scale * jax.random.normal(ks[8], (1, n3), jnp.float32),
    }


if __name__ == "__main__":
    key = jax.random.PRNGKey(0)

    # Small synthetic config (PDTB-3 style sense counts: 4 / 14 / 22)
    B, S, H, VOCAB = 2, 8, 32, 64
    N1, N2, N3 = 4, 14, 22

    k_ids, k_param = jax.random.split(key)
    input_ids = jax.random.randint(k_ids, (B, S), 0, VOCAB, dtype=jnp.int32)
    attention_mask = jnp.ones((B, S), dtype=jnp.int32)

    params = init_params(k_param, VOCAB, H, N1, N2, N3)
    fused = fuse_and_pad_params(params)

    logits = multi_iddr_classifier_forward(input_ids, attention_mask, params, fused)
    jax.block_until_ready(logits)

    # Full-precision reference of the (unfolded) forward, eval-mode dropout == identity.
    cls_f32 = (jnp.take(params["embed"], input_ids[:, 0], axis=0)
               * attention_mask[:, 0, None].astype(jnp.float32))
    h_ref = cls_f32 @ params["wh"] + params["bh"]
    ref = {
        "classifier_level_1": h_ref @ params["w1"] + params["b1"],
        "classifier_level_2": h_ref @ params["w2"] + params["b2"],
        "classifier_level_3": h_ref @ params["w3"] + params["b3"],
    }
    for name in ref:
        assert logits[name].shape == ref[name].shape, name
        assert jnp.allclose(logits[name], ref[name], atol=2e-3, rtol=2e-2), name

    print("KERNEL_OK")
</pallas_src>

<mosaic_0001>
module attributes {stable_mosaic.version = 11 : i64} {
  func.func @_iddr_fused_kernel(%arg0: i32, %arg1: memref<2x128xbf16, #tpu.memory_space<vmem>>, %arg2: memref<128x128xbf16, #tpu.memory_space<vmem>>, %arg3: memref<1x128xf32, #tpu.memory_space<vmem>>, %arg4: memref<2x128xf32, #tpu.memory_space<vmem>>) attributes {dimension_semantics = [#tpu.dimension_semantics<parallel>], iteration_bounds = array<i64: 1>, scalar_prefetch = 0 : i64, scratch_operands = 0 : i64, tpu.core_type = #tpu.core_type<tc>, window_params = [{transform_indices = @transform_0, window_bounds = array<i64: 2, 128>}, {pipeline_mode = #tpu.pipeline_mode<synchronous>, transform_indices = @transform_1, window_bounds = array<i64: 128, 128>}, {pipeline_mode = #tpu.pipeline_mode<synchronous>, transform_indices = @transform_2, window_bounds = array<i64: 1, 128>}, {transform_indices = @transform_3, window_bounds = array<i64: 2, 128>}]} {
    %c0 = arith.constant 0 : index
    %c0_0 = arith.constant 0 : index
    %0 = vector.load %arg1[%c0, %c0_0] : memref<2x128xbf16, #tpu.memory_space<vmem>>, vector<2x128xbf16>
    %c0_1 = arith.constant 0 : index
    %c0_2 = arith.constant 0 : index
    %1 = vector.load %arg2[%c0_1, %c0_2] : memref<128x128xbf16, #tpu.memory_space<vmem>>, vector<128x128xbf16>
    %cst = arith.constant dense<0.000000e+00> : vector<2x128xf32>
    %2 = tpu.matmul %0, %1, %cst {dimension_numbers = #tpu.dot_dimension_numbers<[1], [0], [0], [1], [0, 0, 1, 1], [], []>} : vector<2x128xbf16>, vector<128x128xbf16>, vector<2x128xf32> -> vector<2x128xf32>
    %c0_3 = arith.constant 0 : index
    %c0_4 = arith.constant 0 : index
    %3 = vector.load %arg3[%c0_3, %c0_4] : memref<1x128xf32, #tpu.memory_space<vmem>>, vector<1x128xf32>
    %4 = vector.broadcast %3 : vector<1x128xf32> to vector<2x128xf32>
    %5 = arith.addf %2, %4 : vector<2x128xf32>
    %c0_5 = arith.constant 0 : index
    %c0_6 = arith.constant 0 : index
    %6 = vector.load %arg4[%c0_5, %c0_6] : memref<2x128xf32, #tpu.memory_space<vmem>>, vector<2x128xf32>
    tpu.vector_store %arg4[%c0_5, %c0_6], %5 {strides = array<i32>} : memref<2x128xf32, #tpu.memory_space<vmem>>, vector<2x128xf32>,
    return
  }
  func.func @transform_0(%arg0: i32) -> (i32, i32) {
    %c0_i32 = arith.constant 0 : i32
    %c0_i32_0 = arith.constant 0 : i32
    return %arg0, %c0_i32 : i32, i32
  }
  func.func @transform_1(%arg0: i32) -> (i32, i32) {
    %c0_i32 = arith.constant 0 : i32
    %c0_i32_0 = arith.constant 0 : i32
    %c0_i32_1 = arith.constant 0 : i32
    return %c0_i32, %c0_i32_0 : i32, i32
  }
  func.func @transform_2(%arg0: i32) -> (i32, i32) {
    %c0_i32 = arith.constant 0 : i32
    %c0_i32_0 = arith.constant 0 : i32
    %c0_i32_1 = arith.constant 0 : i32
    return %c0_i32, %c0_i32_0 : i32, i32
  }
  func.func @transform_3(%arg0: i32) -> (i32, i32) {
    %c0_i32 = arith.constant 0 : i32
    %c0_i32_0 = arith.constant 0 : i32
    return %arg0, %c0_i32 : i32, i32
  }
}

</mosaic_0001>

<bundles_post_ra>
// kernel: tpu_custom_call.1
= control target key start
LH: loop header
LB: loop body
LE: loop exit
PB: predicated region body
PF: predicated region fallthrough
CT: control target
= control target key end

     0   :  { %8 = vsyncpa [#allocation3], 0  ;;  %s329_s0 = inlined_call_operand.hbm [shape: bf16[2,128], index: 0, kind: input, shape index: {}]   ;;  %s330_s1 = inlined_call_operand.hbm [shape: bf16[128,128], index: 1, kind: input, shape index: {}]   ;;  %s331_s2 = inlined_call_operand.vmem [shape: f32[1,128], index: 2, kind: input, shape index: {}]   ;;  %s332_s3 = inlined_call_operand.hbm [shape: f32[2,128], index: 3, kind: output, shape index: {}]  }
   0x1   :  { %9 = vsyncpa [#allocation6], 0 }
   0x2   :  { %10 = vsyncpa [#allocation4], 0  ;;  %s290_s12 = smov [#allocation2]   ;;  %s291_s14 = smov [#allocation5]  }
   0x3   :  { %s17_s13 = sshll.u32 %s290_s12, 4  ;;  %s26_s15 = sshll.u32 %s291_s14, 4  ;;  %s18_s13 = int_to_ptr.vmem [resolvable:$true] %s17_s13  ;;  %s27_s15 = int_to_ptr.vmem [resolvable:$true] %s26_s15 }
   0x4   :  { %s232_s16 = scalar_lea.vmem %s18_s13, 16  ;;  %s236_s17 = scalar_lea.vmem %s18_s13, 32 }
   0x5   :  { %p233_p0 = scmp.ne.s32.totalorder %s18_s13, %s232_s16  ;;  %p237_p1 = scmp.lt.s32.totalorder %s18_s13, %s18_s13 }
   0x6   :  { %p238_p2 = scmp.lt.s32.totalorder %s236_s17, %s232_s16 }
   0x8   :  { %p239_p3 = por %p238_p2, %p237_p1 }
   0xa   :  { %p240_p4 = pnand %p239_p3, %p233_p0 }
   0xc   :  { %243 = shalt.err (!%p240_p4)
}
   0xd   :  { %20 = dma.hbm_to_vmem [thread:$0]  %s329_s0, 16, %s18_s13, [#allocation3]  }
   0xe   :  { %s252_s20 = scalar_lea.vmem %s27_s15, 1024  ;;  %p257_p6 = scmp.lt.s32.totalorder %s27_s15, %s27_s15 }
   0xf   :  { %p253_p5 = scmp.ne.s32.totalorder %s27_s15, %s252_s20  ;;  %p258_p7 = scmp.lt.s32.totalorder %s252_s20, %s252_s20 }
  0x11   :  { %p259_p8 = por %p258_p7, %p257_p6 }
  0x13   :  { %p260_p9 = pnand %p259_p8, %p253_p5 }
  0x15   :  { %263 = shalt.err (!%p260_p9)
}
  0x16   :  { %s292_s21 = smov 64   ;;  %s293_s22 = smov 4  }
  0x17   :  { %32 = dma.hbm_to_vmem [thread:$0]  %s330_s1, 1024, %s27_s15, [#allocation6], %s292_s21, %s292_s21, %s293_s22  }
  0x18   :  { %284 = dma.done.wait [#allocation3], 16  }
  0x19   :  { %285 = vsyncadd [#allocation3], 4294967280 }
  0x1a   :  { %286 = dma.done.wait [#allocation6], 1024  }
  0x1b   :  { %287 = vsyncadd [#allocation6], 4294966272  ;;  %v294_v0 = vmov 0.0   ;;  %vm295_vm0 = vmmov 0   ;;  %v216_v1 = vld [vmem:[#allocation5 + $0x38] sm:$0xff]   ;;  %v217_v2 = vld [vmem:[#allocation5 + $0x30] sm:$0xff]  }
  0x1c   :  { %189 = vmatprep.subr.bf16.mxu0 %v294_v0  ;;  %205 = vmatprep.mubr.msk.bf16.mxu0 %vm295_vm0, %v294_v0  ;;  %v218_v3 = vld [vmem:[#allocation5 + $0x28] sm:$0xff]   ;;  %v219_v4 = vld [vmem:[#allocation5 + $0x20] sm:$0xff]   ;;  %v220_v5 = vld [vmem:[#allocation5 + $0x18] sm:$0xff]   ;;  %s296_s25 = smov [#allocation7]  }
  0x1d   :  { %190 = vmatpush3.bf16.msra.mxu0 %v216_v1  ;;  %v221_v6 = vld [vmem:[#allocation5 + $0x10] sm:$0xff]   ;;  %v222_v7 = vld [vmem:[#allocation5 + $0x8] sm:$0xff]   ;;  %v223_v8 = vld [vmem:[#allocation5] sm:$0xff]   ;;  %s161_s26 = sshll.u32 %s296_s25, 4  ;;  %s162_s26 = int_to_ptr.vmem [resolvable:$true] %s161_s26 }
  0x1e   :  { %191 = vmatprep.subr.bf16.mxu0 %v294_v0  ;;  %v42_v9 = vld [vmem:[#allocation2] sm:$0x1]  ;;  %s264_s27 = scalar_lea.vmem %s162_s26, 32  ;;  %p269_p11 = scmp.lt.s32.totalorder %s162_s26, %s162_s26 }
  0x1f   :  { %v171_v10 = vld [vmem:[%s331_s2] ss:$0 sm:$0xff]  ;;  %p265_p10 = scmp.ne.s32.totalorder %s162_s26, %s264_s27  ;;  %p270_p12 = scmp.lt.s32.totalorder %s264_s27, %s264_s27 }
  0x21   :  { %192 = vmatpush3.bf16.msra.mxu0 %v217_v2  ;;  %p271_p13 = por %p270_p12, %p269_p11 }
  0x22   :  { %193 = vmatprep.subr.bf16.mxu0 %v294_v0 }
  0x23   :  { %p272_p0 = pnand %p271_p13, %p265_p10 }
  0x25   :  { %194 = vmatpush3.bf16.msra.mxu0 %v218_v3 }
  0x26   :  { %195 = vmatprep.subr.bf16.mxu0 %v294_v0 }
  0x29   :  { %196 = vmatpush3.bf16.msra.mxu0 %v219_v4 }
  0x2a   :  { %197 = vmatprep.subr.bf16.mxu0 %v294_v0 }
  0x2d   :  { %198 = vmatpush3.bf16.msra.mxu0 %v220_v5 }
  0x2e   :  { %199 = vmatprep.subr.bf16.mxu0 %v294_v0 }
  0x31   :  { %200 = vmatpush3.bf16.msra.mxu0 %v221_v6 }
  0x32   :  { %201 = vmatprep.subr.bf16.mxu0 %v294_v0 }
  0x35   :  { %202 = vmatpush3.bf16.msra.mxu0 %v222_v7 }
  0x36   :  { %203 = vmatprep.subr.bf16.mxu0 %v294_v0 }
  0x39   :  { %204 = vmatpush3.bf16.msra.mxu0 %v223_v8 }
  0x3c   :  { %206 = vmatmul.mubr.bf16.vlgmr.msra.gmra.mxu0 %v42_v9 }
  0xfc   :  { %v148_v11 = vpop.f32.mrf.mxu0 }
  0xfd   :  { %v149_v12 = vadd.f32 %v171_v10, %v148_v11 }
  0xfe   :  { %v207_v13 = vpop.f32.mrf.mxu0 }
  0xff   :  { %154 = vst [vmem:[#allocation7] sm:$0x3] %v149_v12 }
 0x100   :  { %v151_v14 = vpop.f32.mrf.mxu0 }
 0x101   :  { %275 = shalt.err (!%p272_p0)
}
 0x102   :  { %164 = dma.vmem_to_hbm [thread:$0]  %s162_s26, 32, %s332_s3, [#allocation4]   ;;  %v208_v15 = vpop.f32.mrf.mxu0 }
 0x103   :  { %288 = dma.done.wait [#allocation4], 32  }
 0x104   :  { %289 = vsyncadd [#allocation4], 4294967264 }
 0x105   :  { %168 = vsyncpa [#allocation3], 1 }
 0x106   :  { %169 = vsyncpa [#allocation6], 1 }
 0x107   :  { %170 = vsyncpa [#allocation4], 1 }

</bundles_post_ra>
